<compile_context>
chip_gen: v6e
topology: v6e:2x2x1
jax: 0.10.0
libtpu: 0.0.40
codegen_flags: <defaults>
</compile_context>

<pallas_src>
import math

import jax
import jax.numpy as jnp
from jax import lax
from jax.experimental import pallas as pl
from jax.experimental.pallas import tpu as pltpu


def _make_kernel(num_heads, head_dim, kernel_size, seq_len, q_tile, embed,
                 compute_dtype):
    H, D, K, S, Tq, E = num_heads, head_dim, kernel_size, seq_len, q_tile, embed
    pad = K // 2
    cd = compute_dtype

    def kernel(xq_ref, xs_ref, wqkv_ref, bqkv_ref, wcf_ref, bc_ref,
               wo_ref, bo_ref, o_ref, k_scr, v_scr, ctx_scr):
        qi = pl.program_id(1)

        w = wqkv_ref[...].astype(cd)          # [E, 3E] (q part pre-scaled)
        bqkv = bqkv_ref[0]                    # [3E] f32

        # ---- K / V projection: once per batch element, held in VMEM scratch.
        @pl.when(qi == 0)
        def _():
            xs = xs_ref[0].astype(cd)                                   # [S, E]
            kv = jnp.dot(xs, w[:, E:], preferred_element_type=jnp.float32)
            kv = kv + bqkv[E:]
            k_scr[...] = kv[:, :E].astype(k_scr.dtype)
            v_scr[...] = kv[:, E:].astype(v_scr.dtype)

        # ---- Q projection for this query tile (scale already folded in).
        xq = xq_ref[0].astype(cd)                                       # [Tq, E]
        q = jnp.dot(xq, w[:, :E], preferred_element_type=jnp.float32) + bqkv[:E]
        q = q.astype(cd)
        k = k_scr[...]
        v = v_scr[...]

        # ---- Per-head scaled scores via column slices (no [H,S,D] transpose).
        score_list = []
        for h in range(H):
            qh = q[:, h * D:(h + 1) * D]                                # [Tq, D]
            kh = k[:, h * D:(h + 1) * D]                                # [S, D]
            score_list.append(
                lax.dot_general(qh, kh, (((1,), (1,)), ((), ())),
                                preferred_element_type=jnp.float32))    # [Tq, S]
        scores = jnp.stack(score_list, axis=0)                          # [H, Tq, S]

        # ---- Conv1d over head channels along the key axis: all K taps fused
        # into one contraction against the host-prefused [H, K*H] weight.
        key_idx = lax.broadcasted_iota(jnp.int32, (1, Tq, S), 2)
        taps = []
        for j in range(K):                      # static unroll, K is small/odd
            off = j - pad
            if off == 0:
                taps.append(scores)
            else:
                # shifted[..., t] = scores[..., t + off], zero outside [0, S)
                rolled = pltpu.roll(scores, shift=(-off) % S, axis=2)
                if off > 0:
                    mask = key_idx < (S - off)
                else:
                    mask = key_idx >= (-off)
                taps.append(jnp.where(mask, rolled, 0.0))
        stacked = jnp.concatenate(taps, axis=0)                         # [K*H, Tq, S]
        conv = jnp.dot(wcf_ref[...].astype(cd),
                       stacked.reshape(K * H, Tq * S).astype(cd),
                       preferred_element_type=jnp.float32)              # [H, Tq*S]
        conv = conv.reshape(H, Tq, S) + bc_ref[0].reshape(H, 1, 1)

        # ---- Softmax over keys (f32); reciprocal on the EUP slot.
        m = jnp.max(conv, axis=-1, keepdims=True)
        p = jnp.exp(conv - m)
        denom = jnp.sum(p, axis=-1, keepdims=True)
        attn = (p * pl.reciprocal(denom, approx=True)).astype(cd)       # [H, Tq, S]

        # ---- attention * V per head, written into column slices of [Tq, E].
        for h in range(H):
            vh = v[:, h * D:(h + 1) * D]                                # [S, D]
            ctx_h = jnp.dot(attn[h], vh, preferred_element_type=jnp.float32)
            ctx_scr[:, h * D:(h + 1) * D] = ctx_h.astype(ctx_scr.dtype)
        ctx = ctx_scr[...]                                              # [Tq, E]

        y = jnp.dot(ctx, wo_ref[...].astype(cd),
                    preferred_element_type=jnp.float32) + bo_ref[0]
        o_ref[0] = y.astype(o_ref.dtype)

    return kernel


def conv_attention(x, params, num_heads, kernel_size, q_tile=None,
                   compute_dtype=jnp.float32):
    B, S, E = x.shape
    H = num_heads
    D = E // H
    K = kernel_size
    assert E % H == 0
    # PyTorch Conv1d(padding=K//2) only preserves the key length for odd K.
    assert K % 2 == 1, "even kernel_size changes Conv1d output length"

    # Query-block tile: full S for small sequences, 128 otherwise.
    if q_tile is None:
        q_tile = 128 if (S % 128 == 0) else S
    assert S % q_tile == 0 and (q_tile % 8 == 0 or q_tile == S)
    nq = S // q_tile

    wq, bq, wk, bk, wv, bv, wc, bc, wo, bo = params
    scale = 1.0 / math.sqrt(D)
    # Fuse QKV into one matmul; fold 1/sqrt(D) into the query projection.
    wqkv = jnp.concatenate([wq * scale, wk, wv], axis=1)        # [E, 3E]
    bqkv = jnp.concatenate([bq * scale, bk, bv], axis=1)        # [1, 3E]
    # Conv weight [K, H_out, H_in] -> one [H_out, K*H_in] matrix (tap-major).
    wcf = jnp.transpose(wc, (1, 0, 2)).reshape(H, K * H)

    kernel = _make_kernel(H, D, K, S, q_tile, E, compute_dtype)

    def const(shape):
        return pl.BlockSpec(shape, lambda b, qi: (0,) * len(shape))

    grid_spec = pltpu.PrefetchScalarGridSpec(
        num_scalar_prefetch=0,
        grid=(B, nq),
        in_specs=[
            pl.BlockSpec((1, q_tile, E), lambda b, qi: (b, qi, 0)),  # x (Q rows)
            pl.BlockSpec((1, S, E), lambda b, qi: (b, 0, 0)),        # x (full, K/V)
            const((E, 3 * E)), const((1, 3 * E)),                    # fused QKV
            const((H, K * H)), const((1, H)),                        # fused conv
            const((E, E)), const((1, E)),                            # out proj
        ],
        out_specs=pl.BlockSpec((1, q_tile, E), lambda b, qi: (b, qi, 0)),
        scratch_shapes=[
            pltpu.VMEM((S, E), compute_dtype),       # K (per batch element)
            pltpu.VMEM((S, E), compute_dtype),       # V (per batch element)
            pltpu.VMEM((q_tile, E), compute_dtype),  # per-block context
        ],
    )

    return pl.pallas_call(
        kernel,
        out_shape=jax.ShapeDtypeStruct((B, S, E), jnp.float32),
        grid_spec=grid_spec,
        compiler_params=pltpu.CompilerParams(
            # q-block axis must stay "arbitrary": K/V scratch is filled at
            # q_block == 0 and reused by later blocks of the same batch row.
            dimension_semantics=("parallel", "arbitrary")),
    )(x, x, wqkv, bqkv, wcf, bc, wo, bo)


def conv_attention_ref(x, params, num_heads, kernel_size):
    """Pure-JAX reference matching the PyTorch forward (mask=None)."""
    B, S, E = x.shape
    H = num_heads
    D = E // H
    K = kernel_size
    pad = K // 2
    wq, bq, wk, bk, wv, bv, wc, bc, wo, bo = params

    q = (x @ wq + bq[0]).reshape(B, S, H, D).transpose(0, 2, 1, 3)
    k = (x @ wk + bk[0]).reshape(B, S, H, D).transpose(0, 2, 1, 3)
    v = (x @ wv + bv[0]).reshape(B, S, H, D).transpose(0, 2, 1, 3)

    scores = jnp.einsum('bhqd,bhkd->bhqk', q, k) / math.sqrt(D)     # [B,H,Sq,Sk]

    # Conv1d over channels H along Sk, zero-padded ("same").
    sp = jnp.pad(scores, ((0, 0), (0, 0), (0, 0), (pad, pad)))
    conv = jnp.zeros_like(scores)
    for j in range(K):
        conv = conv + jnp.einsum('oi,biqk->boqk', wc[j], sp[..., j:j + S])
    conv = conv + bc[0].reshape(1, H, 1, 1)

    attn = jax.nn.softmax(conv, axis=-1)
    ctx = jnp.einsum('bhqk,bhkd->bhqd', attn, v)
    ctx = ctx.transpose(0, 2, 1, 3).reshape(B, S, E)
    return ctx @ wo + bo[0]


if __name__ == "__main__":
    B, S, E, H, K = 2, 8, 32, 4, 3

    key = jax.random.PRNGKey(0)
    keys = jax.random.split(key, 12)
    init = lambda k, shape: (0.1 * jax.random.normal(k, shape)).astype(jnp.float32)

    x = init(keys[0], (B, S, E))
    params = (
        init(keys[1], (E, E)), init(keys[2], (1, E)),      # query_linear
        init(keys[3], (E, E)), init(keys[4], (1, E)),      # key_linear
        init(keys[5], (E, E)), init(keys[6], (1, E)),      # value_linear
        init(keys[7], (K, H, H)), init(keys[8], (1, H)),   # conv (tap-major)
        init(keys[9], (E, E)), init(keys[10], (1, E)),     # out_linear
    )

    out = conv_attention(x, params, num_heads=H, kernel_size=K)
    out = jax.block_until_ready(out)

    ref = conv_attention_ref(x, params, num_heads=H, kernel_size=K)
    assert out.shape == (B, S, E)
    max_err = float(jnp.max(jnp.abs(out - ref)))
    assert jnp.allclose(out, ref, rtol=1e-3, atol=1e-3), f"mismatch: {max_err}"

    print("KERNEL_OK")
</pallas_src>

<mosaic_0001>
module attributes {stable_mosaic.version = 11 : i64} {
  func.func @kernel(%arg0: i32, %arg1: i32, %arg2: memref<1x8x32xf32, #tpu.memory_space<vmem>>, %arg3: memref<1x8x32xf32, #tpu.memory_space<vmem>>, %arg4: memref<32x96xf32, #tpu.memory_space<vmem>>, %arg5: memref<1x96xf32, #tpu.memory_space<vmem>>, %arg6: memref<4x12xf32, #tpu.memory_space<vmem>>, %arg7: memref<1x4xf32, #tpu.memory_space<vmem>>, %arg8: memref<32x32xf32, #tpu.memory_space<vmem>>, %arg9: memref<1x32xf32, #tpu.memory_space<vmem>>, %arg10: memref<1x8x32xf32, #tpu.memory_space<vmem>>, %arg11: memref<8x32xf32, #tpu.memory_space<vmem>>, %arg12: memref<8x32xf32, #tpu.memory_space<vmem>>, %arg13: memref<8x32xf32, #tpu.memory_space<vmem>>) attributes {dimension_semantics = [#tpu.dimension_semantics<parallel>, #tpu.dimension_semantics<arbitrary>], iteration_bounds = array<i64: 2, 1>, scalar_prefetch = 0 : i64, scratch_operands = 3 : i64, tpu.core_type = #tpu.core_type<tc>, window_params = [{transform_indices = @transform_0, window_bounds = array<i64: 1, 8, 32>}, {transform_indices = @transform_1, window_bounds = array<i64: 1, 8, 32>}, {pipeline_mode = #tpu.pipeline_mode<synchronous>, transform_indices = @transform_2, window_bounds = array<i64: 32, 96>}, {pipeline_mode = #tpu.pipeline_mode<synchronous>, transform_indices = @transform_3, window_bounds = array<i64: 1, 96>}, {pipeline_mode = #tpu.pipeline_mode<synchronous>, transform_indices = @transform_4, window_bounds = array<i64: 4, 12>}, {pipeline_mode = #tpu.pipeline_mode<synchronous>, transform_indices = @transform_5, window_bounds = array<i64: 1, 4>}, {pipeline_mode = #tpu.pipeline_mode<synchronous>, transform_indices = @transform_6, window_bounds = array<i64: 32, 32>}, {pipeline_mode = #tpu.pipeline_mode<synchronous>, transform_indices = @transform_7, window_bounds = array<i64: 1, 32>}, {transform_indices = @transform_8, window_bounds = array<i64: 1, 8, 32>}]} {
    %c0 = arith.constant 0 : index
    %c0_0 = arith.constant 0 : index
    %0 = vector.load %arg4[%c0, %c0_0] : memref<32x96xf32, #tpu.memory_space<vmem>>, vector<32x96xf32>
    %c0_1 = arith.constant 0 : index
    %c0_2 = arith.constant 0 : index
    %1 = vector.load %arg5[%c0_1, %c0_2] : memref<1x96xf32, #tpu.memory_space<vmem>>, vector<1x96xf32>
    %2 = vector.shape_cast %1 : vector<1x96xf32> to vector<96xf32>
    %c0_i32 = arith.constant 0 : i32
    %3 = arith.cmpi eq, %arg1, %c0_i32 : i32
    %4 = arith.extui %3 : i1 to i32
    %c0_i32_3 = arith.constant 0 : i32
    %5 = arith.cmpi ne, %4, %c0_i32_3 : i32
    scf.if %5 {
      %c0_45 = arith.constant 0 : index
      %c0_46 = arith.constant 0 : index
      %c0_47 = arith.constant 0 : index
      %99 = vector.load %arg3[%c0_45, %c0_46, %c0_47] : memref<1x8x32xf32, #tpu.memory_space<vmem>>, vector<1x8x32xf32>
      %100 = vector.shape_cast %99 : vector<1x8x32xf32> to vector<8x32xf32>
      %101 = vector.extract_strided_slice %0 {offsets = [0, 32], sizes = [32, 64], strides = [1, 1]} : vector<32x96xf32> to vector<32x64xf32>
      %cst_48 = arith.constant dense<0.000000e+00> : vector<8x64xf32>
      %102 = tpu.matmul %100, %101, %cst_48 {dimension_numbers = #tpu.dot_dimension_numbers<[1], [0], [0], [1], [0, 0, 1, 1], [], []>} : vector<8x32xf32>, vector<32x64xf32>, vector<8x64xf32> -> vector<8x64xf32>
      %103 = vector.extract_strided_slice %2 {offsets = [32], sizes = [64], strides = [1]} : vector<96xf32> to vector<64xf32>
      %104 = vector.shape_cast %103 : vector<64xf32> to vector<1x64xf32>
      %105 = vector.broadcast %104 : vector<1x64xf32> to vector<8x64xf32>
      %106 = arith.addf %102, %105 : vector<8x64xf32>
      %107 = vector.extract_strided_slice %106 {offsets = [0, 0], sizes = [8, 32], strides = [1, 1]} : vector<8x64xf32> to vector<8x32xf32>
      %c0_49 = arith.constant 0 : index
      %c0_50 = arith.constant 0 : index
      %108 = vector.load %arg11[%c0_49, %c0_50] : memref<8x32xf32, #tpu.memory_space<vmem>>, vector<8x32xf32>
      tpu.vector_store %arg11[%c0_49, %c0_50], %107 {strides = array<i32>} : memref<8x32xf32, #tpu.memory_space<vmem>>, vector<8x32xf32>,
      %109 = vector.extract_strided_slice %106 {offsets = [0, 32], sizes = [8, 32], strides = [1, 1]} : vector<8x64xf32> to vector<8x32xf32>
      %c0_51 = arith.constant 0 : index
      %c0_52 = arith.constant 0 : index
      %110 = vector.load %arg12[%c0_51, %c0_52] : memref<8x32xf32, #tpu.memory_space<vmem>>, vector<8x32xf32>
      tpu.vector_store %arg12[%c0_51, %c0_52], %109 {strides = array<i32>} : memref<8x32xf32, #tpu.memory_space<vmem>>, vector<8x32xf32>,
    } else {
    }
    %c0_4 = arith.constant 0 : index
    %c0_5 = arith.constant 0 : index
    %c0_6 = arith.constant 0 : index
    %6 = vector.load %arg2[%c0_4, %c0_5, %c0_6] : memref<1x8x32xf32, #tpu.memory_space<vmem>>, vector<1x8x32xf32>
    %7 = vector.shape_cast %6 : vector<1x8x32xf32> to vector<8x32xf32>
    %8 = vector.extract_strided_slice %0 {offsets = [0, 0], sizes = [32, 32], strides = [1, 1]} : vector<32x96xf32> to vector<32x32xf32>
    %cst = arith.constant dense<0.000000e+00> : vector<8x32xf32>
    %9 = tpu.matmul %7, %8, %cst {dimension_numbers = #tpu.dot_dimension_numbers<[1], [0], [0], [1], [0, 0, 1, 1], [], []>} : vector<8x32xf32>, vector<32x32xf32>, vector<8x32xf32> -> vector<8x32xf32>
    %10 = vector.extract_strided_slice %2 {offsets = [0], sizes = [32], strides = [1]} : vector<96xf32> to vector<32xf32>
    %11 = vector.shape_cast %10 : vector<32xf32> to vector<1x32xf32>
    %12 = vector.broadcast %11 : vector<1x32xf32> to vector<8x32xf32>
    %13 = arith.addf %9, %12 : vector<8x32xf32>
    %c0_7 = arith.constant 0 : index
    %c0_8 = arith.constant 0 : index
    %14 = vector.load %arg11[%c0_7, %c0_8] : memref<8x32xf32, #tpu.memory_space<vmem>>, vector<8x32xf32>
    %c0_9 = arith.constant 0 : index
    %c0_10 = arith.constant 0 : index
    %15 = vector.load %arg12[%c0_9, %c0_10] : memref<8x32xf32, #tpu.memory_space<vmem>>, vector<8x32xf32>
    %16 = vector.extract_strided_slice %13 {offsets = [0, 0], sizes = [8, 8], strides = [1, 1]} : vector<8x32xf32> to vector<8x8xf32>
    %17 = vector.extract_strided_slice %14 {offsets = [0, 0], sizes = [8, 8], strides = [1, 1]} : vector<8x32xf32> to vector<8x8xf32>
    %cst_11 = arith.constant dense<0.000000e+00> : vector<8x8xf32>
    %18 = tpu.matmul %16, %17, %cst_11 {dimension_numbers = #tpu.dot_dimension_numbers<[1], [1], [0], [0], [0, 0, 1, 0], [], []>} : vector<8x8xf32>, vector<8x8xf32>, vector<8x8xf32> -> vector<8x8xf32>
    %19 = vector.extract_strided_slice %13 {offsets = [0, 8], sizes = [8, 8], strides = [1, 1]} : vector<8x32xf32> to vector<8x8xf32>
    %20 = vector.extract_strided_slice %14 {offsets = [0, 8], sizes = [8, 8], strides = [1, 1]} : vector<8x32xf32> to vector<8x8xf32>
    %cst_12 = arith.constant dense<0.000000e+00> : vector<8x8xf32>
    %21 = tpu.matmul %19, %20, %cst_12 {dimension_numbers = #tpu.dot_dimension_numbers<[1], [1], [0], [0], [0, 0, 1, 0], [], []>} : vector<8x8xf32>, vector<8x8xf32>, vector<8x8xf32> -> vector<8x8xf32>
    %22 = vector.extract_strided_slice %13 {offsets = [0, 16], sizes = [8, 8], strides = [1, 1]} : vector<8x32xf32> to vector<8x8xf32>
    %23 = vector.extract_strided_slice %14 {offsets = [0, 16], sizes = [8, 8], strides = [1, 1]} : vector<8x32xf32> to vector<8x8xf32>
    %cst_13 = arith.constant dense<0.000000e+00> : vector<8x8xf32>
    %24 = tpu.matmul %22, %23, %cst_13 {dimension_numbers = #tpu.dot_dimension_numbers<[1], [1], [0], [0], [0, 0, 1, 0], [], []>} : vector<8x8xf32>, vector<8x8xf32>, vector<8x8xf32> -> vector<8x8xf32>
    %25 = vector.extract_strided_slice %13 {offsets = [0, 24], sizes = [8, 8], strides = [1, 1]} : vector<8x32xf32> to vector<8x8xf32>
    %26 = vector.extract_strided_slice %14 {offsets = [0, 24], sizes = [8, 8], strides = [1, 1]} : vector<8x32xf32> to vector<8x8xf32>
    %cst_14 = arith.constant dense<0.000000e+00> : vector<8x8xf32>
    %27 = tpu.matmul %25, %26, %cst_14 {dimension_numbers = #tpu.dot_dimension_numbers<[1], [1], [0], [0], [0, 0, 1, 0], [], []>} : vector<8x8xf32>, vector<8x8xf32>, vector<8x8xf32> -> vector<8x8xf32>
    %28 = vector.shape_cast %18 : vector<8x8xf32> to vector<1x8x8xf32>
    %29 = vector.shape_cast %21 : vector<8x8xf32> to vector<1x8x8xf32>
    %30 = vector.shape_cast %24 : vector<8x8xf32> to vector<1x8x8xf32>
    %31 = vector.shape_cast %27 : vector<8x8xf32> to vector<1x8x8xf32>
    %32 = tpu.concatenate %28, %29, %30, %31 in 0 : vector<1x8x8xf32>, vector<1x8x8xf32>, vector<1x8x8xf32>, vector<1x8x8xf32> -> vector<4x8x8xf32>
    %33 = tpu.iota {dimensions = array<i32: 2>} : vector<1x8x8xi32>
    %c1_i32 = arith.constant 1 : i32
    %34 = tpu.dynamic_rotate %32 by %c1_i32 dim 2 : vector<4x8x8xf32>, i32 -> vector<4x8x8xf32>
    %c1_i32_15 = arith.constant 1 : i32
    %35 = vector.broadcast %c1_i32_15 : i32 to vector<1x8x8xi32>
    %36 = arith.cmpi sge, %33, %35 : vector<1x8x8xi32>
    %cst_16 = arith.constant 0.000000e+00 : f32
    %37 = vector.shape_cast %36 : vector<1x8x8xi1> to vector<1x8x8xi1>
    %38 = vector.broadcast %37 : vector<1x8x8xi1> to vector<4x8x8xi1>
    %39 = vector.broadcast %cst_16 : f32 to vector<4x8x8xf32>
    %40 = arith.select %38, %34, %39 : vector<4x8x8xi1>, vector<4x8x8xf32>
    %c7_i32 = arith.constant 7 : i32
    %41 = tpu.dynamic_rotate %32 by %c7_i32 dim 2 : vector<4x8x8xf32>, i32 -> vector<4x8x8xf32>
    %c7_i32_17 = arith.constant 7 : i32
    %42 = vector.broadcast %c7_i32_17 : i32 to vector<1x8x8xi32>
    %43 = arith.cmpi slt, %33, %42 : vector<1x8x8xi32>
    %cst_18 = arith.constant 0.000000e+00 : f32
    %44 = vector.shape_cast %43 : vector<1x8x8xi1> to vector<1x8x8xi1>
    %45 = vector.broadcast %44 : vector<1x8x8xi1> to vector<4x8x8xi1>
    %46 = vector.broadcast %cst_18 : f32 to vector<4x8x8xf32>
    %47 = arith.select %45, %41, %46 : vector<4x8x8xi1>, vector<4x8x8xf32>
    %48 = tpu.concatenate %40, %32, %47 in 0 : vector<4x8x8xf32>, vector<4x8x8xf32>, vector<4x8x8xf32> -> vector<12x8x8xf32>
    %c0_19 = arith.constant 0 : index
    %c0_20 = arith.constant 0 : index
    %49 = vector.load %arg6[%c0_19, %c0_20] : memref<4x12xf32, #tpu.memory_space<vmem>>, vector<4x12xf32>
    %50 = vector.shape_cast %48 : vector<12x8x8xf32> to vector<12x64xf32>
    %cst_21 = arith.constant dense<0.000000e+00> : vector<4x64xf32>
    %51 = tpu.matmul %49, %50, %cst_21 {dimension_numbers = #tpu.dot_dimension_numbers<[1], [0], [0], [1], [0, 0, 1, 1], [], []>} : vector<4x12xf32>, vector<12x64xf32>, vector<4x64xf32> -> vector<4x64xf32>
    %52 = vector.shape_cast %51 : vector<4x64xf32> to vector<4x8x8xf32>
    %c0_22 = arith.constant 0 : index
    %c0_23 = arith.constant 0 : index
    %53 = vector.load %arg7[%c0_22, %c0_23] : memref<1x4xf32, #tpu.memory_space<vmem>>, vector<1x4xf32>
    %54 = vector.shape_cast %53 : vector<1x4xf32> to vector<4xf32>
    %55 = vector.shape_cast %54 : vector<4xf32> to vector<4x1x1xf32>
    %56 = vector.broadcast %55 : vector<4x1x1xf32> to vector<4x8x8xf32>
    %57 = arith.addf %52, %56 : vector<4x8x8xf32>
    %cst_24 = arith.constant dense<0xFF800000> : vector<4x8xf32>
    %58 = vector.multi_reduction <maximumf>, %57, %cst_24 [2] : vector<4x8x8xf32> to vector<4x8xf32>
    %59 = vector.shape_cast %58 : vector<4x8xf32> to vector<4x8x1xf32>
    %60 = vector.broadcast %59 : vector<4x8x1xf32> to vector<4x8x8xf32>
    %61 = arith.subf %57, %60 : vector<4x8x8xf32>
    %62 = math.exp %61 : vector<4x8x8xf32>
    %cst_25 = arith.constant dense<0.000000e+00> : vector<4x8xf32>
    %63 = vector.multi_reduction <add>, %62, %cst_25 [2] : vector<4x8x8xf32> to vector<4x8xf32>
    %64 = vector.shape_cast %63 : vector<4x8xf32> to vector<4x8x1xf32>
    %65 = tpu.reciprocal %64 {approx = true} : vector<4x8x1xf32> -> vector<4x8x1xf32>
    %66 = vector.broadcast %65 : vector<4x8x1xf32> to vector<4x8x8xf32>
    %67 = arith.mulf %62, %66 : vector<4x8x8xf32>
    %68 = vector.extract_strided_slice %15 {offsets = [0, 0], sizes = [8, 8], strides = [1, 1]} : vector<8x32xf32> to vector<8x8xf32>
    %69 = vector.extract_strided_slice %67 {offsets = [0, 0, 0], sizes = [1, 8, 8], strides = [1, 1, 1]} : vector<4x8x8xf32> to vector<1x8x8xf32>
    %70 = vector.shape_cast %69 : vector<1x8x8xf32> to vector<8x8xf32>
    %cst_26 = arith.constant dense<0.000000e+00> : vector<8x8xf32>
    %71 = tpu.matmul %70, %68, %cst_26 {dimension_numbers = #tpu.dot_dimension_numbers<[1], [0], [0], [1], [0, 0, 1, 1], [], []>} : vector<8x8xf32>, vector<8x8xf32>, vector<8x8xf32> -> vector<8x8xf32>
    %c0_27 = arith.constant 0 : index
    %c0_28 = arith.constant 0 : index
    %72 = vector.load %arg13[%c0_27, %c0_28] : memref<8x32xf32, #tpu.memory_space<vmem>>, vector<8x8xf32>
    tpu.vector_store %arg13[%c0_27, %c0_28], %71 {strides = array<i32>} : memref<8x32xf32, #tpu.memory_space<vmem>>, vector<8x8xf32>,
    %73 = vector.extract_strided_slice %15 {offsets = [0, 8], sizes = [8, 8], strides = [1, 1]} : vector<8x32xf32> to vector<8x8xf32>
    %74 = vector.extract_strided_slice %67 {offsets = [1, 0, 0], sizes = [1, 8, 8], strides = [1, 1, 1]} : vector<4x8x8xf32> to vector<1x8x8xf32>
    %75 = vector.shape_cast %74 : vector<1x8x8xf32> to vector<8x8xf32>
    %cst_29 = arith.constant dense<0.000000e+00> : vector<8x8xf32>
    %76 = tpu.matmul %75, %73, %cst_29 {dimension_numbers = #tpu.dot_dimension_numbers<[1], [0], [0], [1], [0, 0, 1, 1], [], []>} : vector<8x8xf32>, vector<8x8xf32>, vector<8x8xf32> -> vector<8x8xf32>
    %c0_30 = arith.constant 0 : index
    %c8 = arith.constant 8 : index
    %77 = vector.load %arg13[%c0_30, %c8] : memref<8x32xf32, #tpu.memory_space<vmem>>, vector<8x8xf32>
    tpu.vector_store %arg13[%c0_30, %c8], %76 {strides = array<i32>} : memref<8x32xf32, #tpu.memory_space<vmem>>, vector<8x8xf32>,
    %78 = vector.extract_strided_slice %15 {offsets = [0, 16], sizes = [8, 8], strides = [1, 1]} : vector<8x32xf32> to vector<8x8xf32>
    %79 = vector.extract_strided_slice %67 {offsets = [2, 0, 0], sizes = [1, 8, 8], strides = [1, 1, 1]} : vector<4x8x8xf32> to vector<1x8x8xf32>
    %80 = vector.shape_cast %79 : vector<1x8x8xf32> to vector<8x8xf32>
    %cst_31 = arith.constant dense<0.000000e+00> : vector<8x8xf32>
    %81 = tpu.matmul %80, %78, %cst_31 {dimension_numbers = #tpu.dot_dimension_numbers<[1], [0], [0], [1], [0, 0, 1, 1], [], []>} : vector<8x8xf32>, vector<8x8xf32>, vector<8x8xf32> -> vector<8x8xf32>
    %c0_32 = arith.constant 0 : index
    %c16 = arith.constant 16 : index
    %82 = vector.load %arg13[%c0_32, %c16] : memref<8x32xf32, #tpu.memory_space<vmem>>, vector<8x8xf32>
    tpu.vector_store %arg13[%c0_32, %c16], %81 {strides = array<i32>} : memref<8x32xf32, #tpu.memory_space<vmem>>, vector<8x8xf32>,
    %83 = vector.extract_strided_slice %15 {offsets = [0, 24], sizes = [8, 8], strides = [1, 1]} : vector<8x32xf32> to vector<8x8xf32>
    %84 = vector.extract_strided_slice %67 {offsets = [3, 0, 0], sizes = [1, 8, 8], strides = [1, 1, 1]} : vector<4x8x8xf32> to vector<1x8x8xf32>
    %85 = vector.shape_cast %84 : vector<1x8x8xf32> to vector<8x8xf32>
    %cst_33 = arith.constant dense<0.000000e+00> : vector<8x8xf32>
    %86 = tpu.matmul %85, %83, %cst_33 {dimension_numbers = #tpu.dot_dimension_numbers<[1], [0], [0], [1], [0, 0, 1, 1], [], []>} : vector<8x8xf32>, vector<8x8xf32>, vector<8x8xf32> -> vector<8x8xf32>
    %c0_34 = arith.constant 0 : index
    %c24 = arith.constant 24 : index
    %87 = vector.load %arg13[%c0_34, %c24] : memref<8x32xf32, #tpu.memory_space<vmem>>, vector<8x8xf32>
    tpu.vector_store %arg13[%c0_34, %c24], %86 {strides = array<i32>} : memref<8x32xf32, #tpu.memory_space<vmem>>, vector<8x8xf32>,
    %c0_35 = arith.constant 0 : index
    %c0_36 = arith.constant 0 : index
    %88 = vector.load %arg13[%c0_35, %c0_36] : memref<8x32xf32, #tpu.memory_space<vmem>>, vector<8x32xf32>
    %c0_37 = arith.constant 0 : index
    %c0_38 = arith.constant 0 : index
    %89 = vector.load %arg8[%c0_37, %c0_38] : memref<32x32xf32, #tpu.memory_space<vmem>>, vector<32x32xf32>
    %cst_39 = arith.constant dense<0.000000e+00> : vector<8x32xf32>
    %90 = tpu.matmul %88, %89, %cst_39 {dimension_numbers = #tpu.dot_dimension_numbers<[1], [0], [0], [1], [0, 0, 1, 1], [], []>} : vector<8x32xf32>, vector<32x32xf32>, vector<8x32xf32> -> vector<8x32xf32>
    %c0_40 = arith.constant 0 : index
    %c0_41 = arith.constant 0 : index
    %91 = vector.load %arg9[%c0_40, %c0_41] : memref<1x32xf32, #tpu.memory_space<vmem>>, vector<1x32xf32>
    %92 = vector.shape_cast %91 : vector<1x32xf32> to vector<32xf32>
    %93 = vector.shape_cast %92 : vector<32xf32> to vector<1x32xf32>
    %94 = vector.broadcast %93 : vector<1x32xf32> to vector<8x32xf32>
    %95 = arith.addf %90, %94 : vector<8x32xf32>
    %c0_42 = arith.constant 0 : index
    %c0_43 = arith.constant 0 : index
    %c0_44 = arith.constant 0 : index
    %96 = vector.load %arg10[%c0_42, %c0_43, %c0_44] : memref<1x8x32xf32, #tpu.memory_space<vmem>>, vector<1x8x32xf32>
    %97 = vector.shape_cast %96 : vector<1x8x32xf32> to vector<8x32xf32>
    %98 = vector.shape_cast %95 : vector<8x32xf32> to vector<1x8x32xf32>
    tpu.vector_store %arg10[%c0_42, %c0_43, %c0_44], %98 {strides = array<i32>} : memref<1x8x32xf32, #tpu.memory_space<vmem>>, vector<1x8x32xf32>,
    return
  }
  func.func @transform_0(%arg0: i32, %arg1: i32) -> (i32, i32, i32) {
    %c0_i32 = arith.constant 0 : i32
    %c0_i32_0 = arith.constant 0 : i32
    return %arg0, %arg1, %c0_i32 : i32, i32, i32
  }
  func.func @transform_1(%arg0: i32, %arg1: i32) -> (i32, i32, i32) {
    %c0_i32 = arith.constant 0 : i32
    %c0_i32_0 = arith.constant 0 : i32
    %c0_i32_1 = arith.constant 0 : i32
    return %arg0, %c0_i32, %c0_i32_0 : i32, i32, i32
  }
  func.func @transform_2(%arg0: i32, %arg1: i32) -> (i32, i32) {
    %c0_i32 = arith.constant 0 : i32
    %c0_i32_0 = arith.constant 0 : i32
    %c0_i32_1 = arith.constant 0 : i32
    return %c0_i32, %c0_i32_0 : i32, i32
  }
  func.func @transform_3(%arg0: i32, %arg1: i32) -> (i32, i32) {
    %c0_i32 = arith.constant 0 : i32
    %c0_i32_0 = arith.constant 0 : i32
    %c0_i32_1 = arith.constant 0 : i32
    return %c0_i32, %c0_i32_0 : i32, i32
  }
  func.func @transform_4(%arg0: i32, %arg1: i32) -> (i32, i32) {
    %c0_i32 = arith.constant 0 : i32
    %c0_i32_0 = arith.constant 0 : i32
    %c0_i32_1 = arith.constant 0 : i32
    return %c0_i32, %c0_i32_0 : i32, i32
  }
  func.func @transform_5(%arg0: i32, %arg1: i32) -> (i32, i32) {
    %c0_i32 = arith.constant 0 : i32
    %c0_i32_0 = arith.constant 0 : i32
    %c0_i32_1 = arith.constant 0 : i32
    return %c0_i32, %c0_i32_0 : i32, i32
  }
  func.func @transform_6(%arg0: i32, %arg1: i32) -> (i32, i32) {
    %c0_i32 = arith.constant 0 : i32
    %c0_i32_0 = arith.constant 0 : i32
    %c0_i32_1 = arith.constant 0 : i32
    return %c0_i32, %c0_i32_0 : i32, i32
  }
  func.func @transform_7(%arg0: i32, %arg1: i32) -> (i32, i32) {
    %c0_i32 = arith.constant 0 : i32
    %c0_i32_0 = arith.constant 0 : i32
    %c0_i32_1 = arith.constant 0 : i32
    return %c0_i32, %c0_i32_0 : i32, i32
  }
  func.func @transform_8(%arg0: i32, %arg1: i32) -> (i32, i32, i32) {
    %c0_i32 = arith.constant 0 : i32
    %c0_i32_0 = arith.constant 0 : i32
    return %arg0, %arg1, %c0_i32 : i32, i32, i32
  }
}

</mosaic_0001>

<bundles_post_ra>
// kernel: tpu_custom_call.1
= control target key start
LH: loop header
LB: loop body
LE: loop exit
PB: predicated region body
PF: predicated region fallthrough
CT: control target
= control target key end

     0   :  { %s3052_s0 = inlined_call_operand.hbm [shape: f32[2,8,32], index: 0, kind: input, shape index: {}]   ;;  %s3053_s1 = inlined_call_operand.hbm [shape: f32[2,8,32], index: 1, kind: input, shape index: {}]   ;;  %s3054_s2 = inlined_call_operand.hbm [shape: f32[32,96], index: 2, kind: input, shape index: {}]   ;;  %s3055_s3 = inlined_call_operand.vmem [shape: f32[1,96], index: 3, kind: input, shape index: {}]   ;;  %s3056_s4 = inlined_call_operand.vmem [shape: f32[4,12], index: 4, kind: input, shape index: {}]   ;;  %s3057_s5 = inlined_call_operand.vmem [shape: f32[1,4], index: 5, kind: input, shape index: {}]   ;;  %s3058_s6 = inlined_call_operand.hbm [shape: f32[32,32], index: 6, kind: input, shape index: {}]   ;;  %s3059_s7 = inlined_call_operand.vmem [shape: f32[1,32], index: 7, kind: input, shape index: {}]   ;;  %s3060_s8 = inlined_call_operand.hbm [shape: f32[2,8,32], index: 8, kind: output, shape index: {}]  }
   0x1   :  { %3064 = sst [smem:[#allocation21_spill]] %s3052_s0 }
   0x2   :  { %3065 = sst [smem:[#allocation22_spill]] %s3053_s1 }
   0x3   :  { %3066 = sst [smem:[#allocation23_spill]] %s3054_s2 }
   0x4   :  { %3067 = sst [smem:[#allocation24_spill]] %s3058_s6 }
   0x5   :  { %13 = vsyncpa [#allocation6], 0 }
   0x6   :  { %15 = vsyncpa [#allocation6 + $0x1], 0 }
   0x7   :  { %16 = vsyncpa [#allocation9], 0 }
   0x8   :  { %18 = vsyncpa [#allocation9 + $0x1], 0 }
   0x9   :  { %19 = vsyncpa [#allocation12], 0 }
   0xa   :  { %20 = vsyncpa [#allocation7], 0 }
   0xb   :  { %22 = vsyncpa [#allocation7 + $0x1], 0  ;;  %s2599_s27 = smov 0   ;;  %s2601_s28 = smov 0  }
   0xc   :  { %s2603_s29 = smov 0   ;;  %s2605_s30 = smov 0  }
   0xd   :  { %s2607_s9 = smov 0   ;;  %s2609_s10 = smov 0  }
   0xe LB: > { %3068 = sst [smem:[#allocation19_spill]] %s2521_s9  ;;  %s2630_s11 = sadd.s32 4294967295, %s2525_s10   ;;  %s2525_s10 = sphi %s2609_s10, %s28_s10   ;;  %s2521_s9 = sphi %s2607_s9, %s3088_s9   ;;  %s2517_s30 = sphi %s2605_s30, %s3087_s30   ;;  %s2513_s29 = sphi %s2603_s29, %s3091_s29   ;;  %s2509_s28 = sphi %s2601_s28, %s3090_s28   ;;  %s2505_s27 = sphi %s2599_s27, %s3089_s27  }
   0xf   : > { %s2046_s12 = sadd.s32 4294967294, %s2525_s10   ;;  %p62_p0 = scmp.ne.s32.totalorder %s2509_s28, %s2505_s27 }
  0x10   : > { %p3061_p1 = scmp.eq.s32.totalorder %s2630_s11, 0  ;;  %p246_p3 = scmp.eq.s32.totalorder %s2046_s12, 1 }
  0x11   : > { %p2047_p5 = scmp.ge.s32.totalorder %s2525_s10, 1  ;;  %p253_p7 = scmp.lt.s32.totalorder %s2525_s10, 3 }
  0x12   : > { %p2639_p4 = por %p3061_p1, %p62_p0  ;;  %p2644_p6 = por %p246_p3, %p62_p0 }
  0x13   : > { %p2649_p8 = pnand %p2047_p5, %p253_p7  ;;  %s2527_s16 = smov [#allocation10]  }
  0x14   : > { %s3070_s14 = scalar_select %p2644_p6, 1, 0 }
  0x15   : > { %s265_s17 = sshll.u32 %s2527_s16, 4  ;;  %p2213_p9 = pneg %p2649_p8  ;;  %s266_s17 = int_to_ptr.vmem [resolvable:$true] %s265_s17 }
  0x16   : > { %s2528_s19 = smov [#allocation11]   ;;  %s2336_s21 = scalar_lea.vmem %s266_s17, 512 }
  0x17   : > { %p2658_p11 = pnand %p2213_p9, %p3061_p1  ;;  %s287_s20 = sshll.u32 %s2528_s19, 4  ;;  %s288_s20 = int_to_ptr.vmem [resolvable:$true] %s287_s20 }
  0x18   : > { %p2337_p13 = scmp.ne.s32.totalorder %s266_s17, %s2336_s21  ;;  %p2344_p5 = scmp.lt.s32.totalorder %s266_s17, %s266_s17 }
  0x19   : > { %p2327_p12 = pneg %p2658_p11  ;;  %p2345_p7 = scmp.lt.s32.totalorder %s2336_s21, %s2336_s21 }
  0x1b   : > { %p2339_p0 = pnand %p2337_p13, %p2327_p12  ;;  %p2346_p10 = por %p2345_p7, %p2344_p5 }
  0x1d   : > { %p2340_p3 = pneg %p2339_p0 }
  0x1f   : > { %p2347_p9 = pnand %p2346_p10, %p2340_p3 }
  0x21   : > { %2350 = shalt.err (!%p2347_p9)
}
  0x22   : > { %s2529_s22 = smov 128   ;;  %s2530_s23 = smov 8  }
  0x23   : > { %s3073_s2 = sld [smem:[#allocation23_spill]]  ;;  %s2362_s26 = scalar_lea.vmem %s288_s20, 512 }
  0x24   : > { %p2363_p1 = scmp.ne.s32.totalorder %s288_s20, %s2362_s26  ;;  %p2370_p2 = scmp.lt.s32.totalorder %s288_s20, %s288_s20 }
  0x25   : > { %p2371_p6 = scmp.lt.s32.totalorder %s2362_s26, %s2362_s26 }
  0x26   : > { %p2365_p13 = pnand %p2363_p1, %p2327_p12 }
  0x27   : > { %p2372_p5 = por %p2371_p6, %p2370_p2 }
  0x28   : > { %p2366_p0 = pneg %p2365_p13 }
  0x29   : > { %2216 = dma.hbm_to_vmem [thread:$0]  (!%p2658_p11), %s3073_s2, 512, %s266_s17, [#allocation9], %s2529_s22, %s2529_s22, %s2530_s23  }
  0x2a   : > { %p2373_p10 = pnand %p2372_p5, %p2366_p0 }
  0x2c   : > { %2376 = shalt.err (!%p2373_p10)
}
  0x2d   : > { %s3074_s6 = sld [smem:[#allocation24_spill]]  ;;  %s40_s17 = sadd.s32 1, %s2521_s9 }
  0x2e   : > { %s49_s19 = sadd.s32 1, %s2513_s29  ;;  %p42_p1 = scmp.ge.s32.totalorder %s40_s17, 2 }
  0x2f   : > { %p56_p2 = scmp.ne.s32.totalorder %s2513_s29, %s2509_s28  ;;  %p57_p6 = scmp.eq.s32.totalorder %s2525_s10, 0 }
  0x30   : > { %p2233_p12 = scmp.lt.s32.totalorder %s2525_s10, 2  ;;  %s3093_s17 = smov (%p42_p1, %s40_s17), 0 }
  0x31   : > { %3075 = sst [smem:[#allocation20_spill]] %s3093_s17  ;;  %p58_p3 = por %p57_p6, %p56_p2 }
  0x32   : > { %p3076_p7 = scmp.eq.s32.totalorder %s2630_s11, 1  ;;  %s44_s21 = ssub.s32 %s2521_s9, %s3093_s17 }
  0x33   : > { %2219 = dma.hbm_to_vmem [thread:$0]  (!%p2658_p11), %s3074_s6, 512, %s288_s20, [#allocation12], %s2529_s22, %s2529_s22, %s2530_s23  }
  0x34   : > { %p2690_p9 = por %p3076_p7, %p56_p2  ;;  %s304_s24 = sand.u32 1, %s2513_s29  }
  0x35   : > { %p47_p13 = scmp.eq.s32.totalorder %s44_s21, 0  ;;  %s2051_s20 = sshll.u32 %s304_s24, 3 }
  0x36   : > { %s2052_s22 = sshll.u32 %s2521_s9, 7  ;;  %s3078_s0 = sld [smem:[#allocation21_spill]] }
  0x37   : > { %s2699_s23 = scalar_select %p47_p13, %s2513_s29, %s49_s19  }
  0x38   : > { %s308_s16 = scalar_lea.vmem [#allocation5], %s2051_s20  ;;  %p2706_p11 = pnand %p2233_p12, %p58_p3 }
  0x39   : > { %s316_s2 = sshll.u32 %s308_s16, 4  ;;  %s3080_s1 = sld [smem:[#allocation22_spill]]  ;;  %s317_s2 = int_to_ptr.vmem [resolvable:$true] %s316_s2 }
  0x3a   : > { %s305_s19 = scalar_lea.sflag [#allocation6], %s304_s24  ;;  %p2379_p0 = pneg %p2706_p11 }
  0x3b   : > { %s2390_s25 = scalar_lea.vmem %s317_s2, 128  ;;  %s2531_s26 = smov [#allocation5]  }
  0x3c   : > { %s314_s12 = scalar_lea.hbm %s3078_s0, %s2052_s22  ;;  %p2391_p5 = scmp.ne.s32.totalorder %s317_s2, %s2390_s25 }
  0x3d   : > { %s2395_s16 = sshll.u32 %s2531_s26, 4  ;;  %s2396_s16 = int_to_ptr.vmem [resolvable:$false] %s2395_s16 }
  0x3e   : > { %p2393_p10 = pnand %p2391_p5, %p2379_p0  ;;  %s2397_s0 = scalar_lea.vmem %s2396_s16, 256 }
  0x3f   : > { %s2713_s9 = scalar_lea.hbm %s3080_s1, %s2052_s22  ;;  %p2398_p2 = scmp.lt.s32.totalorder %s317_s2, %s2396_s16 }
  0x40   : > { %p2394_p1 = pneg %p2393_p10  ;;  %p2399_p6 = scmp.lt.s32.totalorder %s2397_s0, %s2390_s25 }
  0x42   : > { %p2400_p12 = por %p2399_p6, %p2398_p2 }
  0x44   : > { %p2401_p3 = pnand %p2400_p12, %p2394_p1 }
  0x46   : > { %2404 = shalt.err (!%p2401_p3)
}
  0x47   : > { %2223 = dma.hbm_to_vmem [thread:$0]  (!%p2706_p11), %s314_s12, 128, %s317_s2, %s305_s19  }
  0x48   : > { %s323_s17 = sand.u32 1, %s2525_s10   ;;  %s327_s24 = scalar_lea.vmem [#allocation8], %s2051_s20 }
  0x49   : > { %s334_s22 = sshll.u32 %s327_s24, 4  ;;  %s324_s21 = scalar_lea.sflag [#allocation9], %s323_s17  ;;  %s335_s22 = int_to_ptr.vmem [resolvable:$true] %s334_s22 }
  0x4a   : > { %s2418_s1 = scalar_lea.vmem %s335_s22, 128  ;;  %s2532_s0 = smov [#allocation8]  }
  0x4b   : > { %p2419_p7 = scmp.ne.s32.totalorder %s335_s22, %s2418_s1  ;;  %s2423_s25 = sshll.u32 %s2532_s0, 4  ;;  %s2424_s25 = int_to_ptr.vmem [resolvable:$false] %s2423_s25 }
  0x4c   : > { %s2425_s26 = scalar_lea.vmem %s2424_s25, 256  ;;  %p2426_p10 = scmp.lt.s32.totalorder %s335_s22, %s2424_s25 }
  0x4d   : > { %p2421_p13 = pnand %p2419_p7, %p2379_p0  ;;  %p2427_p1 = scmp.lt.s32.totalorder %s2425_s26, %s2418_s1 }
  0x4f   : > { %p2422_p5 = pneg %p2421_p13  ;;  %p2428_p2 = por %p2427_p1, %p2426_p10 }
  0x51   : > { %p2429_p6 = pnand %p2428_p2, %p2422_p5 }
  0x53   : > { %2432 = shalt.err (!%p2429_p6)
}
  0x54   : > { %2226 = dma.hbm_to_vmem [thread:$0]  (!%p2706_p11), %s2713_s9, 128, %s335_s22, %s324_s21  }
  0x55   : > { %343 = sbr.rel (%p2649_p8) target bundleno = 2429 (0x97d), region = 52  ;;  %s2732_s2 = sand.u32 (!%p2649_p8), 1, %s2509_s28  }
  0x56   : > { %s2735_s20 = sshll.u32 (!%p2649_p8), %s2732_s2, 3  ;;  %s346_s1 = scalar_lea.sflag (!%p2649_p8), [#allocation6], %s2732_s2 }
  0x57   : > { %s349_s12 = scalar_lea.vmem (!%p2649_p8), [#allocation5], %s2735_s20 }
  0x5a   : > { %2484 = dma.done.wait (%p2639_p4), %s346_s1, 128  }
  0x5b   : > { %2486 = vsyncadd (%p2639_p4), %s346_s1, 4294967168  ;;  %s354_s6 = sand.u32 1, %s2630_s11   ;;  %s358_s15 = scalar_lea.vmem [#allocation8], %s2735_s20 }
  0x5c   : > { %s355_s9 = scalar_lea.sflag [#allocation9], %s354_s6 }
  0x5d   : > { %2488 = dma.done.wait (%p2639_p4), %s355_s9, 128  }
  0x5e   : > { %2490 = vsyncadd (%p2639_p4), %s355_s9, 4294967168  ;;  %p3081_p8 = scmp.eq.s32.totalorder %s2630_s11, 0 }
  0x60   : > { %2492 = dma.done.wait (%p3081_p8), [#allocation9], 512   ;;  %p3082_p11 = pmov %p3081_p8 }
  0x61   : > { %p3083_p0 = pmov %p3081_p8 }
  0x62   : > { %2494 = vsyncadd (%p3082_p11), [#allocation9], 4294966784 }
  0x63   : > { %2496 = dma.done.wait (%p3083_p0), [#allocation12], 512   ;;  %p3084_p12 = pmov %p3083_p0 }
  0x64   : > { %v2533_v0 = vmov 0.0   ;;  %vm2534_vm0 = vmmov 0   ;;  %v407_v1 = vld [vmem:[#allocation10 + $0x18] sm:$0xff]  ;;  %v405_v2 = vld [vmem:[#allocation10 + $0x8] sm:$0xff]  ;;  %s2535_s13 = smov 96   ;;  %v406_v3 = vld [vmem:[#allocation10 + $0x10] sm:$0xff]  ;;  %v415_v51 = vlaneseq }
  0x65   : > { %2498 = vsyncadd (%p3084_p12), [#allocation12], 4294966784  ;;  %2119 = vmatprep.subr.mxu0 %v2533_v0  ;;  %2130 = vmatprep.subr.mxu1 %v2533_v0  ;;  %v404_v4 = vld [vmem:[#allocation10] sm:$0xff]  ;;  %v2084_v5 = vld [vmem:[%s3055_s3] ss:$0 sm:$0xff]  ;;  %vm438_vm1 = vcmask 261120  }
  0x66   : > { %2127 = vmatprep.mubr.msk.f32.mxu0 %vm2534_vm0, %v2533_v0  ;;  %2138 = vmatprep.mubr.msk.f32.mxu1 %vm2534_vm0, %v2533_v0  ;;  %v518_v6 = vld [vmem:[%s349_s12] sm:$0xff]  ;;  %v413_v11 = vld [vmem:[%s358_s15] sm:$0xff]  ;;  %s2536_s16 = smov 120   ;;  %vm601_vm2 = vcmask 64512   ;;  %s2537_s17 = smov 104   ;;  %vm914_vm3 = vcmask 1047616  }
  0x67   : > { %429 = vrot.lane.b32.xlu0 %v407_v1, %s2535_s13  ;;  %425 = vrot.lane.b32.xlu1 %v405_v2, %s2535_s13  ;;  %s2538_s24 = smov 112   ;;  %s2539_s22 = smov 8   ;;  %v913_v52 = vand.u32 127, %v415_v51  ;;  %v2542_v53 = vmov 1983009808   ;;  %v2855_v59 = vshrl.u32 %v415_v51, 7 }
  0x68   : > { %2131 = vmatpush3.msra.mxu1 %v407_v1  ;;  %s2540_s21 = smov 127   ;;  %s2541_s0 = smov 121   ;;  %v985_v54 = vunpack.c.l.s4 %v2542_v53  ;;  %v2543_v57 = vmov 1934713408   ;;  %vm1244_vm6 = vcmask 130048   ;;  %vm1247_vm7 = vcmask 195584  }
  0x69   : > { %2132 = vmatprep.subr.mxu1 %v2533_v0  ;;  %v1049_v58 = vunpack.c.l.s4 %v2543_v57  ;;  %vm962_vm4 = vcmp.lt.s32.totalorder %v913_v52, 7  ;;  %vm939_vm5 = vcmp.ge.s32.totalorder %v913_v52, 1  ;;  %s2544_s25 = smov 16   ;;  %s2545_s26 = smov 32   ;;  %vm1252_vm8 = vcmask 326656  }
  0x6a   : > { %2133 = vmatpush3.msra.mxu1 %v406_v3  ;;  %v986_v60 = vunpack.c.0.s8 %v985_v54  ;;  %s2546_s1 = smov 48   ;;  %s2547_s12 = smov 24   ;;  %vm1255_vm9 = vcmask 392192   ;;  %vm1258_vm10 = vcmask 457728   ;;  %vm1265_vm11 = vcmask 1043456  }
  0x6b   : > { %427 = vrot.lane.b32.xlu0 %v406_v3, %s2535_s13  ;;  %423 = vrot.lane.b32.xlu1 %v404_v4, %s2535_s13  ;;  %v1050_v1 = vunpack.c.0.s8 %v1049_v58  ;;  %s2548_s6 = smov 40   ;;  %s2549_s9 = smov 56   ;;  %vm1261_vm12 = vcmask 97280   ;;  %vm1656_vm13 = vcmask 130112   ;;  %vm1738_vm14 = vcmask 195712  }
  0x6c   : > { %2134 = vmatprep.subr.mxu1 %v2533_v0  ;;  %s2550_s19 = smov 80   ;;  %vm1820_vm15 = vcmask 261312  }
  0x6d   : > { %2135 = vmatpush3.msra.mxu1 %v405_v2 }
  0x6e   : > { %2136 = vmatprep.subr.mxu1 %v2533_v0 }
  0x6f   : > { %2137 = vmatpush3.msra.mxu1 %v404_v4  ;;  %435 = vrot.lane.b32.xlu0 %v2084_v5, %s2535_s13  ;;  %v2860_v4 = vsub.s32 %v986_v60, %v2855_v59 }
  0x70   : > { %2139 = vmatmul.mubr.msk.f32.vlgmr.msra.gmra.mxu1 %vm438_vm1, %v518_v6  ;;  %2146 = vmatprep.subr.mxu1 %v2533_v0 }
  0x71   : > { %2148 = vmatprep.mubr.msk.f32.mxu1 %vm2534_vm0, %v2533_v0 }
  0xd9   : > { %v430_v7 = vpop.permute.xlu0 %429  ;;  %v426_v8 = vpop.permute.xlu1 %425 }
  0xda   : > { %2120 = vmatpush3.msra.mxu0 %v430_v7 }
  0xdb   : > { %2121 = vmatprep.subr.mxu0 %v2533_v0 }
  0xdd   : > { %v428_v9 = vpop.permute.xlu0 %427  ;;  %v424_v10 = vpop.permute.xlu1 %423 }
  0xde   : > { %2122 = vmatpush3.msra.mxu0 %v428_v9 }
  0xdf   : > { %2123 = vmatprep.subr.mxu0 %v2533_v0 }
  0xe0   : > { %2124 = vmatpush3.msra.mxu0 %v426_v8 }
  0xe1   : > { %2125 = vmatprep.subr.mxu0 %v2533_v0  ;;  %v436_v15 = vpop.permute.xlu0 %435 }
  0xe2   : > { %2126 = vmatpush3.msra.mxu0 %v424_v10 }
  0xe3   : > { %2128 = vmatmul.mubr.msk.f32.vlgmr.msra.gmra.mxu0 %vm438_vm1, %v413_v11  ;;  %2141 = vmatprep.subr.mxu0 %v2533_v0 }
  0xe4   : > { %2143 = vmatprep.mubr.msk.f32.mxu0 %vm2534_vm0, %v2533_v0 }
 0x130   : > { %v595_v12 = vpop.f32.mrf.mxu1 }
 0x131   : > { %v596_v13 = vadd.f32 %v2084_v5, %v595_v12 }
 0x132   : > { %v2140_v14 = vpop.f32.mrf.mxu1 }
 0x133   : > { %678 = vrot.lane.b32.xlu0 %v596_v13, %s2536_s16 }
 0x1a3   : > { %v508_v16 = vpop.f32.mrf.mxu0 }
 0x1a4   : > { %v2790_v17 = vadd.f32 %v508_v16, %v436_v15  ;;  %v2866_v15 = vsub.s32 %v1050_v1, %v2855_v59 }
 0x1a5   : > { %v2129_v18 = vpop.f32.mrf.mxu0  ;;  %v679_v20 = vpop.permute.xlu0 %678 }
 0x1a6   : > { %512 = vst.msk [vmem:[#allocation2] sm:$0xff] %vm438_vm1, %v2790_v17 }
 0x1ad   : > { %v599_v19 = vld [vmem:[#allocation2] sm:$0xff] }
 0x1ae   : > { %680 = vrot.lane.b32.xlu1 %v599_v19, %s2536_s16  ;;  %2142 = vmatpush3.xpose.msk.msra.mxu0 %vm601_vm2, %v599_v19 }
 0x1af   : > { %836 = vrot.lane.b32.xlu0 %v599_v19, %s2537_s17  ;;  %2151 = vmatprep.subr.mxu0 %v2533_v0 }
 0x1b1   : > { %2144 = vmatmul.mubr.msk.f32.vlgmr.msra.gmra.mxu0 %vm601_vm2, %v596_v13 }
 0x1b2   : > { %758 = vrot.lane.b32.xlu1 %v599_v19, %s2538_s24  ;;  %2153 = vmatprep.mubr.msk.f32.mxu0 %vm2534_vm0, %v2533_v0 }
 0x1b3   : > { %834 = vrot.lane.b32.xlu0 %v596_v13, %s2537_s17 }
 0x1b6   : > { %756 = vrot.lane.b32.xlu1 %v596_v13, %s2538_s24 }
 0x220   : > { %v681_v21 = vpop.permute.xlu1 %680 }
 0x221   : > { %v837_v22 = vpop.permute.xlu0 %836  ;;  %2147 = vmatpush3.xpose.msk.msra.mxu1 %vm601_vm2, %v681_v21 }
 0x222   : > { %2156 = vmatprep.subr.mxu1 %v2533_v0 }
 0x224   : > { %v759_v23 = vpop.permute.xlu1 %758  ;;  %2149 = vmatmul.mubr.msk.f32.vlgmr.msra.gmra.mxu1 %vm601_vm2, %v679_v20 }
 0x225   : > { %2152 = vmatpush3.xpose.msk.msra.mxu0 %vm601_vm2, %v759_v23  ;;  %2157 = vmatpush3.xpose.msk.msra.mxu1 %vm601_vm2, %v837_v22  ;;  %v835_v24 = vpop.permute.xlu0 %834 }
 0x226   : > { %2158 = vmatprep.mubr.msk.f32.mxu1 %vm2534_vm0, %v2533_v0  ;;  %2161 = vmatprep.subr.mxu0 %v2533_v0 }
 0x227   : > { %2168 = vmatprep.subr.mxu1 %v2533_v0 }
 0x228   : > { %v757_v25 = vpop.permute.xlu1 %756  ;;  %2159 = vmatmul.mubr.msk.f32.vlgmr.msra.gmra.mxu1 %vm601_vm2, %v835_v24 }
 0x229   : > { %2154 = vmatmul.mubr.msk.f32.vlgmr.msra.gmra.mxu0 %vm601_vm2, %v757_v25  ;;  %2170 = vmatprep.mubr.msk.f32.mxu1 %vm2534_vm0, %v2533_v0 }
 0x22a   : > { %2165 = vmatprep.mubr.msk.f32.mxu0 %vm2534_vm0, %v2533_v0 }
 0x271   : > { %v2819_v26 = vpop.f32.mrf.mxu0 }
 0x272   : > { %915 = vrot.lane.b32.xlu1 %v2819_v26, %s2539_s22 }
 0x273   : > { %v2145_v27 = vpop.f32.mrf.mxu0 }
 0x2e4   : > { %v2823_v28 = vpop.f32.mrf.mxu1  ;;  %v916_v32 = vpop.permute.xlu1 %915 }
 0x2e5   : > { %918 = vrot.lane.b32.xlu0 %v2823_v28, %s2539_s22  ;;  %v917_v35 = vsel %vm914_vm3, %v916_v32, %v2819_v26 }
 0x2e6   : > { %v2150_v29 = vpop.f32.mrf.mxu1 }
 0x2e8   : > { %v2827_v30 = vpop.f32.mrf.mxu1 }
 0x2e9   : > { %v2829_v31 = vpop.f32.mrf.mxu0  ;;  %924 = vrot.lane.b32.xlu0 %v2827_v30, %s2539_s22  ;;  %v1030_v3 = vcombine.low %v2823_v28, %v2827_v30 }
 0x2ea   : > { %921 = vrot.lane.b32.xlu1 %v2829_v31, %s2539_s22  ;;  %v2160_v33 = vpop.f32.mrf.mxu1  ;;  %v1014_v7 = vcombine.low %v2819_v26, %v2829_v31 }
 0x2eb   : > { %v2155_v34 = vpop.f32.mrf.mxu0  ;;  %v1038_v25 = vrot.slane %v1030_v3, %v2860_v4 }
 0x2ec   : > { %v1022_v24 = vrot.slane %v1014_v7, %v2860_v4 }
 0x2ee   : > { %927 = vrot.lane.b32.xlu1 %v917_v35, %s2539_s22  ;;  %v1079_v52 = vcombine.high %v1022_v24, %v1038_v25 }
 0x357   : > { %v919_v36 = vpop.permute.xlu0 %918 }
 0x358   : > { %v920_v37 = vsel %vm914_vm3, %v919_v36, %v2823_v28 }
 0x359   : > { %929 = vrot.lane.b32.xlu0 %v920_v37, %s2539_s22 }
 0x35b   : > { %v925_v38 = vpop.permute.xlu0 %924 }
 0x35c   : > { %v922_v39 = vpop.permute.xlu1 %921  ;;  %v926_v40 = vsel %vm914_vm3, %v925_v38, %v2827_v30 }
 0x35d   : > { %933 = vrot.lane.b32.xlu0 %v926_v40, %s2539_s22  ;;  %v923_v41 = vsel %vm914_vm3, %v922_v39, %v2829_v31  ;;  %v1078_v40 = vcombine.low %v1022_v24, %v1038_v25 }
 0x35e   : > { %931 = vrot.lane.b32.xlu1 %v923_v41, %s2539_s22 }
 0x35f   : > { %v2896_v51 = vrot.slane %v1078_v40, %v2866_v15 }
 0x360   : > { %v928_v42 = vpop.permute.xlu1 %927 }
 0x361   : > { %v935_v43 = vsel %vm914_vm3, %v928_v42, %v2819_v26 }
 0x362   : > { %965 = vrot.lane.b32.xlu1 %v935_v43, %s2540_s21 }
 0x366   : > { %946 = vrot.lane.b32.xlu1 %v935_v43, %s2541_s0 }
 0x3cb   : > { %v930_v44 = vpop.permute.xlu0 %929 }
 0x3cc   : > { %v936_v45 = vsel %vm914_vm3, %v930_v44, %v2823_v28 }
 0x3cd   : > { %967 = vrot.lane.b32.xlu0 %v936_v45, %s2540_s21 }
 0x3cf   : > { %v934_v47 = vpop.permute.xlu0 %933 }
 0x3d0   : > { %v932_v46 = vpop.permute.xlu1 %931  ;;  %v938_v49 = vsel %vm914_vm3, %v934_v47, %v2827_v30 }
 0x3d1   : > { %948 = vrot.lane.b32.xlu0 %v936_v45, %s2541_s0  ;;  %v937_v48 = vsel %vm914_vm3, %v932_v46, %v2829_v31  ;;  %v1031_v45 = vcombine.high %v2823_v28, %v2827_v30  ;;  %v1015_v46 = vcombine.high %v2819_v26, %v2829_v31 }
 0x3d2   : > { %969 = vrot.lane.b32.xlu1 %v937_v48, %s2540_s21 }
 0x3d3   : > { %v1045_v57 = vrot.slane %v1031_v45, %v2860_v4 }
 0x3d4   : > { %v966_v50 = vpop.permute.xlu1 %965 }
 0x3d5   : > { %971 = vrot.lane.b32.xlu0 %v938_v49, %s2540_s21  ;;  %v977_v2 = vsel %vm962_vm4, %v966_v50, 0.0  ;;  %s2551_s21 = smov 88  }
 0x3d6   : > { %950 = vrot.lane.b32.xlu1 %v937_v48, %s2541_s0 }
 0x3d8   : > { %v947_v56 = vpop.permute.xlu1 %946 }
 0x3d9   : > { %952 = vrot.lane.b32.xlu0 %v938_v49, %s2541_s0  ;;  %v958_v16 = vsel %vm939_vm5, %v947_v56, 0.0  ;;  %v1029_v56 = vrot.slane %v1015_v46, %v2860_v4 }
 0x43f   : > { %v968_v55 = vpop.permute.xlu0 %967 }
 0x440   : > { %v978_v8 = vsel %vm962_vm4, %v968_v55, 0.0  ;;  %v1093_v55 = vrot.slane %v1079_v52, %v2866_v15 }
 0x443   : > { %v949_v61 = vpop.permute.xlu0 %948 }
 0x444   : > { %v970_v62 = vpop.permute.xlu1 %969  ;;  %v959_v27 = vsel %vm939_vm5, %v949_v61, 0.0 }
 0x445   : > { %v979_v63 = vsel %vm962_vm4, %v970_v62, 0.0  ;;  %v1094_v62 = vcombine.low %v1029_v56, %v1045_v57 }
 0x446   : > { %v1118_v5 = vcombine.low %v977_v2, %v979_v63  ;;  %v1119_v11 = vcombine.high %v977_v2, %v979_v63 }
 0x447   : > { %v972_v6 = vpop.permute.xlu0 %971 }
 0x448   : > { %v980_v9 = vsel %vm962_vm4, %v972_v6, 0.0  ;;  %v951_v10 = vpop.permute.xlu1 %950  ;;  %v1126_v18 = vrot.slane %v1118_v5, %v2860_v4  ;;  %v1133_v29 = vrot.slane %v1119_v11, %v2860_v4  ;;  %v1102_v5 = vrot.slane %v1094_v62, %v2866_v15 }
 0x449   : > { %v1134_v12 = vcombine.low %v978_v8, %v980_v9  ;;  %v1135_v13 = vcombine.high %v978_v8, %v980_v9  ;;  %v960_v14 = vsel %vm939_vm5, %v951_v10, 0.0  ;;  %v1095_v6 = vcombine.high %v1029_v56, %v1045_v57 }
 0x44a   : > { %v982_v22 = vcombine.low %v958_v16, %v960_v14  ;;  %v983_v49 = vcombine.high %v958_v16, %v960_v14 }
 0x44b   : > { %v1142_v19 = vrot.slane %v1134_v12, %v2860_v4  ;;  %v1149_v20 = vrot.slane %v1135_v13, %v2860_v4  ;;  %v953_v21 = vpop.permute.xlu0 %952  ;;  %v1109_v10 = vrot.slane %v1095_v6, %v2866_v15 }
 0x44c   : > { %v961_v23 = vsel %vm939_vm5, %v953_v21, 0.0  ;;  %v990_v38 = vrot.slane %v982_v22, %v2860_v4  ;;  %v997_v54 = vrot.slane %v983_v49, %v2860_v4 }
 0x44d   : > { %v1150_v32 = vcombine.low %v1126_v18, %v1142_v19  ;;  %v1151_v33 = vcombine.high %v1126_v18, %v1142_v19  ;;  %v998_v34 = vcombine.low %v959_v27, %v961_v23  ;;  %v1166_v35 = vcombine.low %v1133_v29, %v1149_v20 }
 0x44e   : > { %v999_v42 = vcombine.high %v959_v27, %v961_v23  ;;  %v1167_v47 = vcombine.high %v1133_v29, %v1149_v20 }
 0x44f   : > { %v1165_v36 = vrot.slane %v1151_v33, %v2866_v15  ;;  %v2879_v37 = vrot.slane %v1150_v32, %v2866_v15  ;;  %v1006_v39 = vrot.slane %v998_v34, %v2860_v4  ;;  %v1174_v48 = vrot.slane %v1166_v35, %v2866_v15 }
 0x450   : > { %v1013_v28 = vrot.slane %v999_v42, %v2860_v4  ;;  %v1181_v31 = vrot.slane %v1167_v47, %v2866_v15  ;;  %v981_v47 = vld [vmem:[%s3056_s4] sm:$0xf] }
 0x451   : > { %1198 = vrot.lane.b32.xlu0 %v1165_v36, %s2544_s25  ;;  %v1182_v41 = vcombine.high %v2879_v37, %v2533_v0  ;;  %v1046_v43 = vcombine.low %v990_v38, %v1006_v39  ;;  %v1047_v44 = vcombine.high %v990_v38, %v1006_v39  ;;  %v1183_v61 = vcombine.high %v1165_v36, %v2533_v0 }
 0x452   : > { %v1062_v58 = vcombine.low %v997_v54, %v1013_v28  ;;  %v1063_v2 = vcombine.high %v997_v54, %v1013_v28  ;;  %v1184_v3 = vcombine.high %v1174_v48, %v2533_v0  ;;  %v1185_v8 = vcombine.high %v1181_v31, %v2533_v0 }
 0x453   : > { %1190 = vrot.lane.b32.xlu1 %v1182_v41, %s2539_s22  ;;  %v2893_v50 = vrot.slane %v1046_v43, %v2866_v15  ;;  %v1061_v30 = vrot.slane %v1047_v44, %v2866_v15 }
 0x454   : > { %v1070_v1 = vrot.slane %v1062_v58, %v2866_v15  ;;  %v1077_v9 = vrot.slane %v1063_v2, %v2866_v15 }
 0x455   : > { %1214 = vrot.lane.b32.xlu0 %v1174_v48, %s2545_s26  ;;  %v1111_v26 = vcombine.high %v2893_v50, %v2896_v51  ;;  %v1110_v53 = vcombine.low %v2893_v50, %v2896_v51  ;;  %v1112_v60 = vcombine.low %v1061_v30, %v1093_v55  ;;  %v1113_v63 = vcombine.high %v1061_v30, %v1093_v55  ;;  %v2073_v51 = vld [vmem:[%s3057_s5] ss:$0 sm:$0xff] }
 0x456   : > { %v1114_v7 = vcombine.low %v1070_v1, %v1102_v5  ;;  %v1115_v11 = vcombine.high %v1070_v1, %v1102_v5  ;;  %v1117_v12 = vcombine.high %v1077_v9, %v1109_v10  ;;  %v1116_v13 = vcombine.low %v1077_v9, %v1109_v10 }
 0x457   : > { %1188 = vrot.lane.b32.xlu1 %v1111_v26, %s2539_s22  ;;  %v417_v5 = vsub.s32 0, %v2855_v59 }
 0x459   : > { %1230 = vrot.lane.b32.xlu0 %v1181_v31, %s2546_s1 }
 0x45b   : > { %1196 = vrot.lane.b32.xlu1 %v1112_v60, %s2544_s25 }
 0x45d   : > { %1206 = vrot.lane.b32.xlu0 %v1183_v61, %s2547_s12 }
 0x45f   : > { %1204 = vrot.lane.b32.xlu1 %v1113_v63, %s2547_s12 }
 0x461   : > { %1222 = vrot.lane.b32.xlu0 %v1184_v3, %s2548_s6  ;;  %v1443_v3 = vsub.s32 1, %v2855_v59 }
 0x463   : > { %1212 = vrot.lane.b32.xlu1 %v1114_v7, %s2545_s26  ;;  %v1447_v7 = vsub.s32 2, %v2855_v59 }
 0x465   : > { %1238 = vrot.lane.b32.xlu0 %v1185_v8, %s2549_s9  ;;  %v1451_v8 = vsub.s32 3, %v2855_v59 }
 0x467   : > { %1220 = vrot.lane.b32.xlu1 %v1115_v11, %s2548_s6 }
 0x469   : > { %1236 = vrot.lane.b32.xlu0 %v1117_v12, %s2549_s9  ;;  %s1909_s9 = scalar_lea.sflag [#allocation7], %s2732_s2 }
 0x46b   : > { %1228 = vrot.lane.b32.xlu1 %v1116_v13, %s2546_s1  ;;  %s2552_s1 = smov 72  }
 0x4c3   : > { %v1199_v14 = vpop.permute.xlu0 %1198 }
 0x4c5   : > { %v1191_v16 = vpop.permute.xlu1 %1190 }
 0x4c6   : > { %v1243_v21 = vsel %vm601_vm2, %v2879_v37, %v1191_v16 }
 0x4c7   : > { %v1215_v18 = vpop.permute.xlu0 %1214  ;;  %v1246_v23 = vsel %vm1244_vm6, %v1243_v21, %v1199_v14 }
 0x4c9   : > { %v1189_v19 = vpop.permute.xlu1 %1188 }
 0x4ca   : > { %v1242_v38 = vsel %vm601_vm2, %v1110_v53, %v1189_v19 }
 0x4cb   : > { %v1231_v20 = vpop.permute.xlu0 %1230 }
 0x4cd   : > { %v1197_v22 = vpop.permute.xlu1 %1196 }
 0x4ce   : > { %v1245_v40 = vsel %vm1244_vm6, %v1242_v38, %v1197_v22 }
 0x4cf   : > { %v1207_v24 = vpop.permute.xlu0 %1206 }
 0x4d0   : > { %v1249_v25 = vsel %vm1247_vm7, %v1246_v23, %v1207_v24 }
 0x4d1   : > { %v1205_v27 = vpop.permute.xlu1 %1204  ;;  %v1251_v29 = vsel %vm438_vm1, %v1249_v25, %v1215_v18 }
 0x4d2   : > { %v1248_v41 = vsel %vm1247_vm7, %v1245_v40, %v1205_v27 }
 0x4d3   : > { %v1223_v32 = vpop.permute.xlu0 %1222 }
 0x4d4   : > { %v1254_v33 = vsel %vm1252_vm8, %v1251_v29, %v1223_v32 }
 0x4d5   : > { %v1213_v34 = vpop.permute.xlu1 %1212  ;;  %v1257_v35 = vsel %vm1255_vm9, %v1254_v33, %v1231_v20 }
 0x4d6   : > { %v1250_v42 = vsel %vm438_vm1, %v1248_v41, %v1213_v34 }
 0x4d7   : > { %v1239_v36 = vpop.permute.xlu0 %1238 }
 0x4d8   : > { %v1260_v37 = vsel %vm1258_vm10, %v1257_v35, %v1239_v36 }
 0x4d9   : > { %2162 = vmatpush3.msk.msra.mxu0 %vm1265_vm11, %v1260_v37  ;;  %v1221_v39 = vpop.permute.xlu1 %1220 }
 0x4da   : > { %2163 = vmatprep.subr.mxu0 %v2533_v0  ;;  %v1253_v43 = vsel %vm1252_vm8, %v1250_v42, %v1221_v39 }
 0x4db   : > { %v1237_v45 = vpop.permute.xlu0 %1236 }
 0x4dd   : > { %v1229_v44 = vpop.permute.xlu1 %1228 }
 0x4de   : > { %v1256_v46 = vsel %vm1255_vm9, %v1253_v43, %v1229_v44 }
 0x4df   : > { %v1259_v48 = vsel %vm1258_vm10, %v1256_v46, %v1237_v45 }
 0x4e0   : > { %2164 = vmatpush3.msra.mxu0 %v1259_v48 }
 0x4e1   : > { %2166 = vmatmul.mubr.msk.f32.vlgmr.msra.gmra.mxu0 %vm1261_vm12, %v981_v47  ;;  %2173 = vmatprep.subr.mxu0 %v2533_v0 }
 0x4e2   : > { %2175 = vmatprep.mubr.msk.f32.mxu0 %vm2534_vm0, %v2533_v0 }
 0x5a1   : > { %v1335_v49 = vpop.f32.mrf.mxu0 }
 0x5a2   : > { %1343 = vrot.lane.b32.xlu0 %v1335_v49, %s2538_s24  ;;  %1340 = vrot.lane.b32.xlu1 %v1335_v49, %s2536_s16 }
 0x5a3   : > { %v2167_v50 = vpop.f32.mrf.mxu0 }
 0x5a6   : > { %1349 = vrot.lane.b32.xlu0 %v1335_v49, %s2535_s13  ;;  %1346 = vrot.lane.b32.xlu1 %v1335_v49, %s2537_s17 }
 0x5aa   : > { %1355 = vrot.lane.b32.xlu0 %v1335_v49, %s2550_s19  ;;  %1352 = vrot.lane.b32.xlu1 %v1335_v49, %s2551_s21 }
 0x5ae   : > { %1358 = vrot.lane.b32.xlu1 %v1335_v49, %s2552_s1  ;;  %1435 = vbcast.lane.b32.xlu0 %v2073_v51, 256 }
 0x614   : > { %v1344_v52 = vpop.permute.xlu0 %1343  ;;  %v1341_v28 = vpop.permute.xlu1 %1340 }
 0x615   : > { %v1361_v53 = vcombine.low %v1335_v49, %v1344_v52 }
 0x617   : > { %v1368_v58 = vrot.slane %v1361_v53, %v2860_v4 }
 0x618   : > { %v1350_v26 = vpop.permute.xlu0 %1349  ;;  %v1347_v30 = vpop.permute.xlu1 %1346 }
 0x619   : > { %v1369_v31 = vcombine.low %v1341_v28, %v1347_v30 }
 0x61b   : > { %v1376_v56 = vrot.slane %v1369_v31, %v2860_v4 }
 0x61c   : > { %v1356_v54 = vpop.permute.xlu0 %1355  ;;  %v1353_v55 = vpop.permute.xlu1 %1352 }
 0x61d   : > { %v1377_v57 = vcombine.low %v1350_v26, %v1356_v54  ;;  %v1393_v62 = vcombine.low %v1368_v58, %v1376_v56  ;;  %v1394_v63 = vcombine.high %v1368_v58, %v1376_v56 }
 0x61f   : > { %v1384_v1 = vrot.slane %v1377_v57, %v2860_v4  ;;  %v1401_v11 = vrot.slane %v1393_v62, %v2866_v15  ;;  %v1408_v12 = vrot.slane %v1394_v63, %v2866_v15 }
 0x620   : > { %v1359_v60 = vpop.permute.xlu1 %1358  ;;  %v1436_v6 = vpop.permute.xlu0 %1435 }
 0x621   : > { %v1385_v61 = vcombine.low %v1353_v55, %v1359_v60  ;;  %v1444_v14 = vrot.slane %v1436_v6, %v1443_v3  ;;  %v1440_v16 = vrot.slane %v1436_v6, %v417_v5  ;;  %v1448_v18 = vrot.slane %v1436_v6, %v1447_v7  ;;  %v1825_v7 = vld [vmem:[#allocation11 + $0x10] sm:$0xff] }
 0x622   : > { %v1452_v19 = vrot.slane %v1436_v6, %v1451_v8  ;;  %v1826_v6 = vld [vmem:[#allocation11 + $0x18] sm:$0xff] }
 0x623   : > { %v1392_v2 = vrot.slane %v1385_v61, %v2860_v4 }
 0x625   : > { %v1409_v9 = vcombine.low %v1384_v1, %v1392_v2  ;;  %v1410_v10 = vcombine.high %v1384_v1, %v1392_v2 }
 0x627   : > { %v1417_v13 = vrot.slane %v1409_v9, %v2866_v15  ;;  %v1424_v4 = vrot.slane %v1410_v10, %v2866_v15  ;;  %v1824_v9 = vld [vmem:[#allocation11 + $0x8] sm:$0xff] }
 0x629   : > { %v1426_v20 = vcombine.high %v1401_v11, %v1417_v13  ;;  %v1425_v21 = vcombine.low %v1401_v11, %v1417_v13  ;;  %v1427_v22 = vcombine.low %v1408_v12, %v1424_v4  ;;  %v1428_v23 = vcombine.high %v1408_v12, %v1424_v4  ;;  %v1823_v11 = vld [vmem:[#allocation11] sm:$0xff] }
 0x62b   : > { %v1454_v24 = vadd.f32 %v1444_v14, %v1426_v20  ;;  %v1453_v59 = vadd.f32 %v1440_v16, %v1425_v21  ;;  %v1455_v29 = vadd.f32 %v1448_v18, %v1427_v22  ;;  %v1456_v32 = vadd.f32 %v1452_v19, %v1428_v23  ;;  %v2078_v21 = vld [vmem:[%s3059_s7] ss:$0 sm:$0xff] }
 0x62d   : > { %v1460_v25 = vsel %vm601_vm2, %v1454_v24, -inf  ;;  %v1457_v27 = vsel %vm601_vm2, %v1453_v59, -inf  ;;  %v1463_v33 = vsel %vm601_vm2, %v1455_v29, -inf  ;;  %v1466_v15 = vsel %vm601_vm2, %v1456_v32, -inf }
 0x62e   : > { %1461 = vmax.xlane.f32.xlu0 %v1460_v25  ;;  %1458 = vmax.xlane.f32.xlu1 %v1457_v27 }
 0x632   : > { %1464 = vmax.xlane.f32.xlu0 %v1463_v33  ;;  %1467 = vmax.xlane.f32.xlu1 %v1466_v15 }
 0x648   : > { %514 = vrot.lane.b32.xlu0 %v2790_v17, %s2535_s13 }
 0x6b7   : > { %v1462_v34 = vpop.xlane.xlu0 %1461  ;;  %v1459_v35 = vpop.xlane.xlu1 %1458 }
 0x6b8   : > { %v1470_v36 = vsub.f32 %v1454_v24, %v1462_v34  ;;  %v1469_v37 = vsub.f32 %v1453_v59, %v1459_v35 }
 0x6ba   : > { %v1473_v38 = vmul.f32 1.442695, %v1469_v37  ;;  %v1475_v39 = vmul.f32 1.442695, %v1470_v36 }
 0x6bb   : > { %v1465_v40 = vpop.xlane.xlu0 %1464  ;;  %v1468_v42 = vpop.xlane.xlu1 %1467 }
 0x6bc   : > { %v1471_v41 = vsub.f32 %v1455_v29, %v1465_v40  ;;  %2309 = vpow2.f32 %v1473_v38  ;;  %v1472_v44 = vsub.f32 %v1456_v32, %v1468_v42 }
 0x6bd   : > { %2311 = vpow2.f32 %v1475_v39 }
 0x6be   : > { %v1477_v43 = vmul.f32 1.442695, %v1471_v41  ;;  %v1479_v46 = vmul.f32 1.442695, %v1472_v44 }
 0x6bf   : > { %v515_v45 = vpop.permute.xlu0 %514 }
 0x6c0   : > { %517 = vst.msk [vmem:[#allocation3] sm:$0xff] %vm438_vm1, %v515_v45  ;;  %2313 = vpow2.f32 %v1477_v43 }
 0x6c1   : > { %2315 = vpow2.f32 %v1479_v46 }
 0x6c7   : > { %v600_v17 = vld [vmem:[#allocation3] sm:$0xff] }
 0x6c8   : > { %1658 = vrot.lane.b32.xlu0 %v600_v17, %s2538_s24  ;;  %2169 = vmatpush3.msra.mxu1 %v600_v17  ;;  %s403_s24 = scalar_lea.vmem [#allocation13], %s2735_s20 }
 0x6c9   : > { %2178 = vmatprep.subr.mxu1 %v2533_v0  ;;  %v2310_v47 = vpop.eup %2309 }
 0x6ca   : > { %v1481_v48 = vsel %vm601_vm2, %v2310_v47, 0.0  ;;  %v2312_v49 = vpop.eup %2311 }
 0x6cb   : > { %1482 = vadd.xlane.f32.xlu1 %v1481_v48  ;;  %v1484_v50 = vsel %vm601_vm2, %v2312_v49, 0.0 }
 0x6cc   : > { %1740 = vrot.lane.b32.xlu0 %v600_v17, %s2537_s17  ;;  %s2081_s17 = sshll.u32 %s2517_s30, 7  ;;  %s2553_s30 = smov [#allocation13]  }
 0x6cd   : > { %v2314_v51 = vpop.eup %2313  ;;  %s3009_s6 = scalar_lea.hbm %s3060_s8, %s2081_s17  ;;  %s2437_s20 = sshll.u32 %s2553_s30, 4  ;;  %s2438_s20 = int_to_ptr.vmem [resolvable:$false] %s2437_s20 }
 0x6ce   : > { %v1487_v52 = vsel %vm601_vm2, %v2314_v51, 0.0  ;;  %v2316_v28 = vpop.eup %2315  ;;  %s2439_s11 = scalar_lea.vmem %s2438_s20, 256 }
 0x6cf   : > { %1485 = vadd.xlane.f32.xlu1 %v1484_v50  ;;  %v1490_v26 = vsel %vm601_vm2, %v2316_v28, 0.0 }
 0x6d3   : > { %1488 = vadd.xlane.f32.xlu1 %v1487_v52 }
 0x6d7   : > { %1491 = vadd.xlane.f32.xlu1 %v1490_v26 }
 0x6e8   : > { %1576 = vrot.lane.b32.xlu1 %v600_v17, %s2536_s16 }
 0x73a   : > { %v1659_v56 = vpop.permute.xlu0 %1658 }
 0x73e   : > { %v1741_v62 = vpop.permute.xlu0 %1740 }
 0x754   : > { %v1483_v30 = vpop.xlane.xlu1 %1482 }
 0x755   : > { %2317 = vrcp.f32 %v1483_v30 }
 0x758   : > { %v1486_v31 = vpop.xlane.xlu1 %1485 }
 0x759   : > { %2319 = vrcp.f32 %v1486_v31 }
 0x75c   : > { %v1489_v53 = vpop.xlane.xlu1 %1488 }
 0x75d   : > { %2321 = vrcp.f32 %v1489_v53 }
 0x760   : > { %v1492_v54 = vpop.xlane.xlu1 %1491 }
 0x761   : > { %2323 = vrcp.f32 %v1492_v54 }
 0x762   : > { %v2318_v55 = vpop.eup %2317 }
 0x763   : > { %v1497_v57 = vmul.f32 %v2318_v55, %v2310_v47 }
 0x764   : > { %v1577_v58 = vpop.permute.xlu1 %1576 }
 0x765   : > { %2171 = vmatmul.mubr.msk.f32.vlgmr.msra.gmra.mxu1 %vm601_vm2, %v1497_v57  ;;  %2174 = vmatpush3.msra.mxu0 %v1577_v58 }
 0x766   : > { %v2320_v60 = vpop.eup %2319  ;;  %2179 = vmatpush3.msra.mxu1 %v1659_v56  ;;  %2183 = vmatprep.subr.mxu0 %v2533_v0 }
 0x767   : > { %v1498_v61 = vmul.f32 %v2320_v60, %v2312_v49  ;;  %2180 = vmatprep.mubr.msk.f32.mxu1 %vm2534_vm0, %v2533_v0  ;;  %2188 = vmatprep.subr.mxu1 %v2533_v0 }
 0x769   : > { %2176 = vmatmul.mubr.msk.f32.vlgmr.msra.gmra.mxu0 %vm601_vm2, %v1498_v61 }
 0x76a   : > { %v2322_v63 = vpop.eup %2321  ;;  %2184 = vmatpush3.msra.mxu0 %v1741_v62  ;;  %2185 = vmatprep.mubr.msk.f32.mxu0 %vm2534_vm0, %v2533_v0 }
 0x76b   : > { %v1499_v1 = vmul.f32 %v2322_v63, %v2314_v51 }
 0x76d   : > { %2181 = vmatmul.mubr.msk.f32.vlgmr.msra.gmra.mxu1 %vm601_vm2, %v1499_v1 }
 0x76e   : > { %v2324_v2 = vpop.eup %2323  ;;  %2196 = vmatprep.mubr.msk.f32.mxu1 %vm2534_vm0, %v2533_v0  ;;  %2189 = vmatpush3.msra.mxu1 %v1826_v6 }
 0x76f   : > { %v1500_v3 = vmul.f32 %v2324_v2, %v2316_v28  ;;  %2190 = vmatprep.subr.mxu1 %v2533_v0 }
 0x770   : > { %2191 = vmatpush3.msra.mxu1 %v1825_v7 }
 0x771   : > { %2186 = vmatmul.mubr.msk.f32.vlgmr.msra.gmra.mxu0 %vm601_vm2, %v1500_v3  ;;  %2192 = vmatprep.subr.mxu1 %v2533_v0 }
 0x772   : > { %2193 = vmatpush3.msra.mxu1 %v1824_v9 }
 0x773   : > { %2194 = vmatprep.subr.mxu1 %v2533_v0 }
 0x774   : > { %2195 = vmatpush3.msra.mxu1 %v1823_v11 }
 0x825   : > { %v1570_v5 = vpop.f32.mrf.mxu1 }
 0x826   : > { %1574 = vst.msk [vmem:[#allocation4] sm:$0xff] %vm601_vm2, %v1570_v5 }
 0x827   : > { %v2172_v8 = vpop.f32.mrf.mxu1 }
 0x829   : > { %v1648_v10 = vpop.f32.mrf.mxu0 }
 0x82a   : > { %1653 = vrot.lane.b32.xlu0 %v1648_v10, %s2539_s22  ;;  %s1923_s22 = sshll.u32 %s403_s24, 4  ;;  %s1924_s22 = int_to_ptr.vmem [resolvable:$true] %s1923_s22 }
 0x82b   : > { %v2177_v12 = vpop.f32.mrf.mxu0  ;;  %s2433_s15 = scalar_lea.vmem %s1924_s22, 128  ;;  %p2440_p13 = scmp.lt.s32.totalorder %s1924_s22, %s2438_s20 }
 0x82c   : > { %p2434_p4 = scmp.ne.s32.totalorder %s1924_s22, %s2433_s15  ;;  %p2441_p5 = scmp.lt.s32.totalorder %s2439_s11, %s2433_s15 }
 0x82d   : > { %v1730_v13 = vpop.f32.mrf.mxu1 }
 0x82e   : > { %1735 = vrot.lane.b32.xlu0 %v1730_v13, %s2544_s25  ;;  %p2435_p3 = pnand %p2434_p4, %p2690_p9  ;;  %p2442_p10 = por %p2441_p5, %p2440_p13 }
 0x82f   : > { %v2182_v14 = vpop.f32.mrf.mxu1 }
 0x830   : > { %p2436_p7 = pneg %p2435_p3 }
 0x831   : > { %v1812_v16 = vpop.f32.mrf.mxu0 }
 0x832   : > { %1817 = vrot.lane.b32.xlu1 %v1812_v16, %s2547_s12  ;;  %p2443_p1 = pnand %p2442_p10, %p2436_p7 }
 0x833   : > { %v2187_v4 = vpop.f32.mrf.mxu0 }
 0x89c   : > { %v1654_v18 = vpop.permute.xlu0 %1653 }
 0x89d   : > { %1657 = vst.msk [vmem:[#allocation4] sm:$0xff] %vm1656_vm13, %v1654_v18 }
 0x8a0   : > { %v1736_v19 = vpop.permute.xlu0 %1735 }
 0x8a1   : > { %1739 = vst.msk [vmem:[#allocation4] sm:$0xff] %vm1738_vm14, %v1736_v19 }
 0x8a4   : > { %v1818_v0 = vpop.permute.xlu1 %1817 }
 0x8a5   : > { %1821 = vst.msk [vmem:[#allocation4] sm:$0xff] %vm1820_vm15, %v1818_v0 }
 0x8ac   : > { %v1822_v20 = vld [vmem:[#allocation4] sm:$0xff] }
 0x8ad   : > { %2197 = vmatmul.mubr.msk.f32.vlgmr.msra.gmra.mxu1 %vm438_vm1, %v1822_v20 }
 0x96d   : > { %v1903_v22 = vpop.f32.mrf.mxu1 }
 0x96e   : > { %v1904_v23 = vadd.f32 %v2078_v21, %v1903_v22 }
 0x96f   : > { %v2198_v24 = vpop.f32.mrf.mxu1 }
 0x970   : > { %1907 = vst.msk [vmem:[%s403_s24] sm:$0xff] %vm438_vm1, %v1904_v23 }
 0x971   : > { %2446 = shalt.err (!%p2443_p1)
}
 0x972   : > { %s2447_s19 = scalar_lea.hbm %s3009_s6, 128  ;;  %s2451_s0 = scalar_lea.hbm %s3060_s8, 256 }
 0x973   : > { %p2448_p2 = scmp.ne.s32.totalorder %s3009_s6, %s2447_s19  ;;  %p2452_p11 = scmp.lt.s32.totalorder %s3009_s6, %s3060_s8 }
 0x974   : > { %p2453_p0 = scmp.lt.s32.totalorder %s2451_s0, %s2447_s19 }
 0x975   : > { %p2449_p6 = pnand %p2448_p2, %p2690_p9 }
 0x976   : > { %p2454_p12 = por %p2453_p0, %p2452_p11 }
 0x977   : > { %p2450_p8 = pneg %p2449_p6 }
 0x979   : > { %p2455_p4 = pnand %p2454_p12, %p2450_p8 }
 0x97b   : > { %2458 = shalt.err (!%p2455_p4)
}
 0x97c   : > { %2211 = dma.vmem_to_hbm [thread:$0]  (%p2690_p9), %s1924_s22, 128, %s3009_s6, %s1909_s9  }
 0x97d PF: > { %s1935_s13 = sand.u32 1, %s2505_s27   ;;  %p3085_p3 = scmp.ne.s32.totalorder %s3070_s14, 0 }
 0x97e   : > { %p3086_p7 = scmp.ge.s32.totalorder %s2525_s10, 2  ;;  %s1936_s16 = scalar_lea.sflag [#allocation7], %s1935_s13 }
 0x980   : > { %p2228_p13 = pnand %p3086_p7, %p3085_p3 }
 0x982   : > { %p2229_p5 = pneg %p2228_p13 }
 0x984   : > { %2500 = dma.done.wait (%p2229_p5), %s1936_s16, 128  }
 0x985   : > { %2502 = vsyncadd (%p2229_p5), %s1936_s16, 4294967168  ;;  %s28_s10 = sadd.s32 1, %s2525_s10   ;;  %s3087_s30 = sld [smem:[#allocation19_spill]] }
 0x986   : > { %p25_p10 = scmp.ge.s32.totalorder %s28_s10, 4   ;;  %s3088_s9 = sld [smem:[#allocation20_spill]] }
 0x987   : > { %s3089_s27 = smov %s2509_s28  ;;  %s3090_s28 = smov %s2513_s29 }
 0x988   : > { %s3091_s29 = smov %s2699_s23  ;;  %27 = sbr.rel (!%p25_p10) target bundleno = 14 (0xe), region = 122 }
 0x98d   :  { %1941 = vsyncpa [#allocation6], 1 }
 0x98e   :  { %1943 = vsyncpa [#allocation6 + $0x1], 1 }
 0x98f   :  { %1944 = vsyncpa [#allocation9], 1 }
 0x990   :  { %1946 = vsyncpa [#allocation9 + $0x1], 1 }
 0x991   :  { %1947 = vsyncpa [#allocation12], 1 }
 0x992   :  { %1948 = vsyncpa [#allocation7], 1 }
 0x993   :  { %1950 = vsyncpa [#allocation7 + $0x1], 1 }

</bundles_post_ra>
